<compile_context>
chip_gen: v7x
topology: tpu7x:2x2x1
jax: 0.10.0
libtpu: 0.0.40
codegen_flags: <defaults>
</compile_context>

<pallas_src>
import functools

import jax
import jax.numpy as jnp
from jax.experimental import pallas as pl
from jax.experimental.pallas import tpu as pltpu


def _round_up(x, m):
    return ((x + m - 1) // m) * m


def actor_kernel(x_ref, w1_ref, b1_ref, w2_ref, b2_ref, probs_ref):
    # bf16 MXU inputs with f32 accumulation; ReLU / softmax stay in f32.
    x = x_ref[...].astype(w1_ref.dtype)
    h = jnp.dot(x, w1_ref[...], preferred_element_type=jnp.float32) + b1_ref[...]
    h = jnp.maximum(h, 0.0)

    logits = jnp.dot(h.astype(w2_ref.dtype), w2_ref[...],
                     preferred_element_type=jnp.float32) + b2_ref[...]

    # Numerically stable softmax over the (unpadded) action axis. Exact divide:
    # the kernel is HBM-bound, so the divide is free and rows sum to exactly 1.
    m = jnp.max(logits, axis=-1, keepdims=True)
    e = jnp.exp(logits - m)
    denom = jnp.sum(e, axis=-1, keepdims=True)
    probs_ref[...] = (e / denom).astype(probs_ref.dtype)


def prepare_params(w1, b1, w2, b2):
    """One-time (hoisted) param prep: cast weights to bf16 for the MXU and pad
    only the *hidden* axis to a lane-dense multiple of 128. The input-feature
    axis (K of the first matmul) and the output/action axis keep their true
    widths so x and probs stream through HBM unpadded. Zero-padding the hidden
    axis is exact: padded hidden columns get zero weight + zero bias -> ReLU 0,
    and multiply zero rows of w2."""
    n_in, n_hid = w1.shape
    n_out = w2.shape[1]
    n_hid_p = _round_up(n_hid, 128)
    w1_p = jnp.zeros((n_in, n_hid_p), jnp.bfloat16).at[:, :n_hid].set(w1.astype(jnp.bfloat16))
    b1_p = jnp.zeros((1, n_hid_p), jnp.float32).at[:, :n_hid].set(b1.astype(jnp.float32))
    w2_p = jnp.zeros((n_hid_p, n_out), jnp.bfloat16).at[:n_hid, :].set(w2.astype(jnp.bfloat16))
    b2_p = b2.astype(jnp.float32).reshape(1, n_out)
    return w1_p, b1_p, w2_p, b2_p


@functools.partial(jax.jit, static_argnames=("tile_b",))
def simple_actor_forward(x, w1_p, b1_p, w2_p, b2_p, *, tile_b=1024):
    """x: (B, N_input) f32; params from prepare_params. Returns probs (B, N_output) f32."""
    B, n_in = x.shape
    n_hid_p = w1_p.shape[1]
    n_out = w2_p.shape[1]
    assert w1_p.shape[0] == n_in and b1_p.shape == (1, n_hid_p)
    assert w2_p.shape[0] == n_hid_p and b2_p.shape == (1, n_out)

    # Batch tile: multiple of 8 sublanes; aim for >= 4 grid steps (keeps both
    # v7x TCs busy and gives the pipeline depth) while capping at tile_b rows
    # so large batches amortize the ~0.35us per-step overhead.
    tb = max(8, min(tile_b, _round_up(pl.cdiv(B, 4), 8)))
    # Remainder tile: OOB reads are garbage rows (harmless — softmax is
    # strictly per-row) and their OOB writes are dropped by Pallas.
    grid = (pl.cdiv(B, tb),)

    return pl.pallas_call(
        actor_kernel,
        out_shape=jax.ShapeDtypeStruct((B, n_out), jnp.float32),
        grid_spec=pltpu.PrefetchScalarGridSpec(
            num_scalar_prefetch=0,
            grid=grid,
            in_specs=[
                # x streamed per batch tile (auto double-buffered), true width.
                pl.BlockSpec((tb, n_in), lambda i: (i, 0)),
                # Weights / biases: whole-array blocks with constant index_map
                # -> resident in VMEM across all batch tiles (tiny here, so the
                # default double-buffering costs nothing that matters).
                pl.BlockSpec((n_in, n_hid_p), lambda i: (0, 0)),
                pl.BlockSpec((1, n_hid_p), lambda i: (0, 0)),
                pl.BlockSpec((n_hid_p, n_out), lambda i: (0, 0)),
                pl.BlockSpec((1, n_out), lambda i: (0, 0)),
            ],
            out_specs=pl.BlockSpec((tb, n_out), lambda i: (i, 0)),
        ),
        compiler_params=pltpu.CompilerParams(
            # No vmem_limit override: working set is a few MiB; 64 MiB would be
            # v7x's entire per-TC VMEM.
            dimension_semantics=("parallel",),
        ),
    )(x, w1_p, b1_p, w2_p, b2_p)


def init_params(key, n_input, n_output, n_hidden):
    """Deterministic init mimicking PyTorch Linear default U(-1/sqrt(in), 1/sqrt(in))."""
    k1, k2, k3, k4 = jax.random.split(key, 4)
    bound1 = 1.0 / jnp.sqrt(jnp.float32(n_input))
    bound2 = 1.0 / jnp.sqrt(jnp.float32(n_hidden))
    # Stored already transposed: (in, out) so the kernel does plain x @ W + b.
    w1 = jax.random.uniform(k1, (n_input, n_hidden), jnp.float32, -bound1, bound1)
    b1 = jax.random.uniform(k2, (1, n_hidden), jnp.float32, -bound1, bound1)
    w2 = jax.random.uniform(k3, (n_hidden, n_output), jnp.float32, -bound2, bound2)
    b2 = jax.random.uniform(k4, (1, n_output), jnp.float32, -bound2, bound2)
    return w1, b1, w2, b2


if __name__ == "__main__":
    N_input, N_hidden, N_output = 16, 32, 8
    batch = 4

    key = jax.random.PRNGKey(0)
    k_x, k_p = jax.random.split(key)
    x = jax.random.normal(k_x, (batch, N_input), jnp.float32)
    w1, b1, w2, b2 = init_params(k_p, N_input, N_output, N_hidden)

    # Param prep (bf16 cast + hidden padding) is hoisted out of the call path.
    params = prepare_params(w1, b1, w2, b2)

    probs = simple_actor_forward(x, *params)
    probs = jax.block_until_ready(probs)

    # Reference check in plain JAX (f32 everywhere; kernel uses bf16 MXU
    # inputs, so compare with a tolerance consistent with bf16 rounding).
    h_ref = jnp.maximum(x @ w1 + b1, 0.0)
    logits_ref = h_ref @ w2 + b2
    probs_ref = jax.nn.softmax(logits_ref, axis=1)

    assert probs.shape == (batch, N_output)
    assert bool(jnp.all(probs >= 0.0))
    assert bool(jnp.allclose(jnp.sum(probs, axis=1), 1.0, atol=1e-4))
    assert bool(jnp.allclose(probs, probs_ref, atol=2e-2))

    print("KERNEL_OK")
</pallas_src>

<mosaic_0001>
module attributes {stable_mosaic.version = 11 : i64} {
  func.func @actor_kernel(%arg0: i32, %arg1: memref<8x16xf32, #tpu.memory_space<vmem>>, %arg2: memref<16x128xbf16, #tpu.memory_space<vmem>>, %arg3: memref<1x128xf32, #tpu.memory_space<vmem>>, %arg4: memref<128x8xbf16, #tpu.memory_space<vmem>>, %arg5: memref<1x8xf32, #tpu.memory_space<vmem>>, %arg6: memref<8x8xf32, #tpu.memory_space<vmem>>) attributes {dimension_semantics = [#tpu.dimension_semantics<parallel>], iteration_bounds = array<i64: 1>, scalar_prefetch = 0 : i64, scratch_operands = 0 : i64, tpu.core_type = #tpu.core_type<tc>, window_params = [{transform_indices = @transform_0, window_bounds = array<i64: 8, 16>}, {pipeline_mode = #tpu.pipeline_mode<synchronous>, transform_indices = @transform_1, window_bounds = array<i64: 16, 128>}, {pipeline_mode = #tpu.pipeline_mode<synchronous>, transform_indices = @transform_2, window_bounds = array<i64: 1, 128>}, {pipeline_mode = #tpu.pipeline_mode<synchronous>, transform_indices = @transform_3, window_bounds = array<i64: 128, 8>}, {pipeline_mode = #tpu.pipeline_mode<synchronous>, transform_indices = @transform_4, window_bounds = array<i64: 1, 8>}, {transform_indices = @transform_5, window_bounds = array<i64: 8, 8>}]} {
    %c0 = arith.constant 0 : index
    %c0_0 = arith.constant 0 : index
    %0 = vector.load %arg1[%c0, %c0_0] : memref<8x16xf32, #tpu.memory_space<vmem>>, vector<8x16xf32>
    %1 = arith.truncf %0 : vector<8x16xf32> to vector<8x16xbf16>
    %c0_1 = arith.constant 0 : index
    %c0_2 = arith.constant 0 : index
    %2 = vector.load %arg2[%c0_1, %c0_2] : memref<16x128xbf16, #tpu.memory_space<vmem>>, vector<16x128xbf16>
    %cst = arith.constant dense<0.000000e+00> : vector<8x128xf32>
    %3 = tpu.matmul %1, %2, %cst {dimension_numbers = #tpu.dot_dimension_numbers<[1], [0], [0], [1], [0, 0, 1, 1], [], []>} : vector<8x16xbf16>, vector<16x128xbf16>, vector<8x128xf32> -> vector<8x128xf32>
    %c0_3 = arith.constant 0 : index
    %c0_4 = arith.constant 0 : index
    %4 = vector.load %arg3[%c0_3, %c0_4] : memref<1x128xf32, #tpu.memory_space<vmem>>, vector<1x128xf32>
    %5 = vector.broadcast %4 : vector<1x128xf32> to vector<8x128xf32>
    %6 = arith.addf %3, %5 : vector<8x128xf32>
    %cst_5 = arith.constant 0.000000e+00 : f32
    %7 = vector.broadcast %cst_5 : f32 to vector<8x128xf32>
    %8 = arith.maximumf %6, %7 : vector<8x128xf32>
    %9 = arith.truncf %8 : vector<8x128xf32> to vector<8x128xbf16>
    %c0_6 = arith.constant 0 : index
    %c0_7 = arith.constant 0 : index
    %10 = vector.load %arg4[%c0_6, %c0_7] : memref<128x8xbf16, #tpu.memory_space<vmem>>, vector<128x8xbf16>
    %cst_8 = arith.constant dense<0.000000e+00> : vector<8x8xf32>
    %11 = tpu.matmul %9, %10, %cst_8 {dimension_numbers = #tpu.dot_dimension_numbers<[1], [0], [0], [1], [0, 0, 1, 1], [], []>} : vector<8x128xbf16>, vector<128x8xbf16>, vector<8x8xf32> -> vector<8x8xf32>
    %c0_9 = arith.constant 0 : index
    %c0_10 = arith.constant 0 : index
    %12 = vector.load %arg5[%c0_9, %c0_10] : memref<1x8xf32, #tpu.memory_space<vmem>>, vector<1x8xf32>
    %13 = vector.broadcast %12 : vector<1x8xf32> to vector<8x8xf32>
    %14 = arith.addf %11, %13 : vector<8x8xf32>
    %cst_11 = arith.constant dense<0xFF800000> : vector<8xf32>
    %15 = vector.multi_reduction <maximumf>, %14, %cst_11 [1] : vector<8x8xf32> to vector<8xf32>
    %16 = vector.shape_cast %15 : vector<8xf32> to vector<8x1xf32>
    %17 = vector.broadcast %16 : vector<8x1xf32> to vector<8x8xf32>
    %18 = arith.subf %14, %17 : vector<8x8xf32>
    %19 = math.exp %18 : vector<8x8xf32>
    %cst_12 = arith.constant dense<0.000000e+00> : vector<8xf32>
    %20 = vector.multi_reduction <add>, %19, %cst_12 [1] : vector<8x8xf32> to vector<8xf32>
    %21 = vector.shape_cast %20 : vector<8xf32> to vector<8x1xf32>
    %22 = vector.broadcast %21 : vector<8x1xf32> to vector<8x8xf32>
    %23 = arith.divf %19, %22 : vector<8x8xf32>
    %c0_13 = arith.constant 0 : index
    %c0_14 = arith.constant 0 : index
    %24 = vector.load %arg6[%c0_13, %c0_14] : memref<8x8xf32, #tpu.memory_space<vmem>>, vector<8x8xf32>
    tpu.vector_store %arg6[%c0_13, %c0_14], %23 {strides = array<i32>} : memref<8x8xf32, #tpu.memory_space<vmem>>, vector<8x8xf32>,
    return
  }
  func.func @transform_0(%arg0: i32) -> (i32, i32) {
    %c0_i32 = arith.constant 0 : i32
    %c0_i32_0 = arith.constant 0 : i32
    return %arg0, %c0_i32 : i32, i32
  }
  func.func @transform_1(%arg0: i32) -> (i32, i32) {
    %c0_i32 = arith.constant 0 : i32
    %c0_i32_0 = arith.constant 0 : i32
    %c0_i32_1 = arith.constant 0 : i32
    return %c0_i32, %c0_i32_0 : i32, i32
  }
  func.func @transform_2(%arg0: i32) -> (i32, i32) {
    %c0_i32 = arith.constant 0 : i32
    %c0_i32_0 = arith.constant 0 : i32
    %c0_i32_1 = arith.constant 0 : i32
    return %c0_i32, %c0_i32_0 : i32, i32
  }
  func.func @transform_3(%arg0: i32) -> (i32, i32) {
    %c0_i32 = arith.constant 0 : i32
    %c0_i32_0 = arith.constant 0 : i32
    %c0_i32_1 = arith.constant 0 : i32
    return %c0_i32, %c0_i32_0 : i32, i32
  }
  func.func @transform_4(%arg0: i32) -> (i32, i32) {
    %c0_i32 = arith.constant 0 : i32
    %c0_i32_0 = arith.constant 0 : i32
    %c0_i32_1 = arith.constant 0 : i32
    return %c0_i32, %c0_i32_0 : i32, i32
  }
  func.func @transform_5(%arg0: i32) -> (i32, i32) {
    %c0_i32 = arith.constant 0 : i32
    %c0_i32_0 = arith.constant 0 : i32
    return %arg0, %c0_i32 : i32, i32
  }
}

</mosaic_0001>

<bundles_post_ra>
// kernel: simple_actor_forward.1
= control target key start
LH: loop header
LB: loop body
LE: loop exit
PB: predicated region body
PF: predicated region fallthrough
CT: control target
= control target key end

     0   :  { %10 = vsyncpa [#allocation3], 0  ;;  %v316_v1 = vmov 0.0   ;;  %vm39_vm0 = vcmask 130048   ;;  %vm317_vm1 = vmmov 0   ;;  %vm196_vm2 = vcmask 64512   ;;  %s402_s0 = inlined_call_operand.vmem [shape: f32[4,16], index: 0, kind: input, shape index: {}]   ;;  %s403_s1 = inlined_call_operand.vmem [shape: bf16[16,128], index: 1, kind: input, shape index: {}]   ;;  %s404_s2 = inlined_call_operand.vmem [shape: f32[1,128], index: 2, kind: input, shape index: {}]   ;;  %s405_s3 = inlined_call_operand.vmem [shape: bf16[128,8], index: 3, kind: input, shape index: {}]   ;;  %s406_s4 = inlined_call_operand.vmem [shape: f32[1,8], index: 4, kind: input, shape index: {}]   ;;  %s407_s5 = inlined_call_operand.hbm [shape: f32[4,8], index: 5, kind: output, shape index: {}]  }
   0x1   :  { %v279_v0 = vld [vmem:[%s403_s1] sm:$0xff]   ;;  %248 = vmatprep.subr.bf16.mxu0 %v316_v1  ;;  %254 = vmatprep.subr.bf16.mxu1 %v316_v1  ;;  %v281_v5 = vld [vmem:[%s405_s3 + $0x8] sm:$0xff]   ;;  %v282_v6 = vld [vmem:[%s405_s3 + $0x10] sm:$0xff]  }
   0x2   :  { %v22_v2 = vld [vmem:[%s402_s0] sm:$0xff]  ;;  %249 = vmatpush3.bf16.msra.mxu0 %v279_v0  ;;  %250 = vmatprep.mubr.msk.bf16.mxu0 %vm317_vm1, %v316_v1  ;;  %v283_v7 = vld [vmem:[%s405_s3 + $0x18] sm:$0xff]   ;;  %v285_v9 = vld [vmem:[%s405_s3 + $0x28] sm:$0xff]  }
   0x3   :  { %v280_v3 = vld [vmem:[%s405_s3] sm:$0xff]   ;;  %v23_v4 = vpack.c.bf16 %v22_v2, %v22_v2  ;;  %270 = vmatprep.mubr.msk.bf16.mxu1 %vm317_vm1, %v316_v1  ;;  %v286_v10 = vld [vmem:[%s405_s3 + $0x30] sm:$0xff]   ;;  %v287_v11 = vld [vmem:[%s405_s3 + $0x38] sm:$0xff]  }
   0x4   :  { %255 = vmatpush3.bf16.msra.mxu1 %v280_v3  ;;  %v284_v8 = vld [vmem:[%s405_s3 + $0x20] sm:$0xff]  }
   0x5   :  { %256 = vmatprep.subr.bf16.mxu1 %v316_v1  ;;  %251 = vmatmul.mubr.msk.bf16.vlgmr.msra.gmra.mrb[0].mxu0 %vm39_vm0, %v23_v4  ;;  %v225_v12 = vld [vmem:[%s404_s2] ss:$0 sm:$0xff] }
   0x6   :  { %v228_v20 = vld [vmem:[%s406_s4] ss:$0 sm:$0xff] }
   0x8   :  { %257 = vmatpush3.bf16.msra.mxu1 %v281_v5 }
   0x9   :  { %258 = vmatprep.subr.bf16.mxu1 %v316_v1 }
   0xc   :  { %259 = vmatpush3.bf16.msra.mxu1 %v282_v6 }
   0xd   :  { %260 = vmatprep.subr.bf16.mxu1 %v316_v1 }
  0x10   :  { %261 = vmatpush3.bf16.msra.mxu1 %v283_v7 }
  0x11   :  { %262 = vmatprep.subr.bf16.mxu1 %v316_v1 }
  0x14   :  { %263 = vmatpush3.bf16.msra.mxu1 %v284_v8 }
  0x15   :  { %264 = vmatprep.subr.bf16.mxu1 %v316_v1 }
  0x18   :  { %265 = vmatpush3.bf16.msra.mxu1 %v285_v9 }
  0x19   :  { %266 = vmatprep.subr.bf16.mxu1 %v316_v1 }
  0x1c   :  { %267 = vmatpush3.bf16.msra.mxu1 %v286_v10 }
  0x1d   :  { %268 = vmatprep.subr.bf16.mxu1 %v316_v1 }
  0x20   :  { %269 = vmatpush3.bf16.msra.mxu1 %v287_v11 }
  0xd8   :  { %v77_v13 = vpop.f32.mrb[0].mxu0 }
  0xd9   :  { %v78_v14 = vadd.f32 %v225_v12, %v77_v13  ;;  %v252_v15 = vpop.f32.mrb[1].mxu0 }
  0xda   :  { %v80_v16 = vpop.f32.mrb[2].mxu0 }
  0xdb   :  { %v83_v17 = vmax.f32 %v78_v14, 0.0  ;;  %v253_v18 = vpop.f32.mrb[3].mxu0 }
  0xdd   :  { %v84_v19 = vpack.c.bf16 %v83_v17, %v83_v17 }
  0xdf   :  { %271 = vmatmul.mubr.bf16.vlgmr.msra.gmra.mrb[0].mxu1 %v84_v19 }
 0x1b2   :  { %v190_v21 = vpop.f32.mrb[0].mxu1 }
 0x1b3   :  { %v191_v22 = vadd.f32 %v228_v20, %v190_v21  ;;  %v272_v23 = vpop.f32.mrb[1].mxu1 }
 0x1b4   :  { %v193_v24 = vpop.f32.mrb[2].mxu1 }
 0x1b5   :  { %v273_v25 = vpop.f32.mrb[3].mxu1  ;;  %v197_v26 = vsel %vm196_vm2, %v191_v22, -inf }
 0x1b6   :  { %198 = vmax.xlane.f32.xlu0 %v197_v26 }
 0x243   :  { %v199_v27 = vpop.xlane.xlu0 %198 }
 0x244   :  { %v200_v28 = vsub.f32 %v191_v22, %v199_v27 }
 0x246   :  { %v201_v29 = vmul.f32 1.442695, %v200_v28 }
 0x248   :  { %288 = vpow2.f32 %v201_v29 }
 0x252   :  { %v289_v30 = vpop.eup %288 }
 0x253   :  { %v203_v31 = vsel %vm196_vm2, %v289_v30, 0.0 }
 0x254   :  { %204 = vadd.xlane.f32.xlu0 %v203_v31 }
 0x2e1   :  { %v205_v32 = vpop.xlane.xlu0 %204 }
 0x2e2   :  { %290 = vrcp.f32 %v205_v32 }
 0x2ec   :  { %v291_v33 = vpop.eup %290 }
 0x2ed   :  { %v207_v34 = vmul.f32 %v291_v33, %v289_v30 }
 0x2ef   :  { %208 = vst.msk [vmem:[#allocation2] sm:$0xff] %vm196_vm2, %v207_v34 }
 0x2f0   :  { %213 = vsyncadd [#allocation3], 64  ;;  %s318_s2 = smov [#allocation2]  }
 0x2f1   :  { %s214_s3 = sshll.u32 %s318_s2, 4  ;;  %s215_s3 = int_to_ptr.vmem [resolvable:$true] %s214_s3 }
 0x2f2   :  { %s292_s4 = scalar_lea.vmem %s215_s3, 64  ;;  %s296_s15 = scalar_lea.vmem %s215_s3, 128 }
 0x2f3   :  { %p293_p0 = scmp.ne.s32.totalorder %s215_s3, %s292_s4  ;;  %p297_p1 = scmp.lt.s32.totalorder %s215_s3, %s215_s3 }
 0x2f4   :  { %p298_p2 = scmp.lt.s32.totalorder %s296_s15, %s292_s4 }
 0x2f6   :  { %p299_p3 = por %p298_p2, %p297_p1 }
 0x2f8   :  { %p300_p4 = pnand %p299_p3, %p293_p0 }
 0x2fa   :  { %303 = shalt.err (!%p300_p4)
}
 0x2fb   :  { %s304_s18 = scalar_lea.hbm %s407_s5, 64 }
 0x2fc   :  { %p305_p5 = scmp.ne.s32.totalorder %s407_s5, %s304_s18  ;;  %p308_p6 = scmp.lt.u32.totalorder %s304_s18, %s407_s5 }
 0x2fe   :  { %p310_p7 = pnand %p308_p6, %p305_p5 }
 0x300   :  { %313 = shalt.err (!%p310_p7)
}
 0x301   :  { %s319_s23 = smov 64   ;;  %s320_s24 = smov 4  }
 0x302   :  { %220 = dma.vmem_to_hbm [thread:$0]  %s215_s3, 64, %s407_s5, [#allocation3], %s319_s23, %s319_s23, %s320_s24  }
 0x303   :  { %314 = dma.done.wait [#allocation3], 128  }
 0x304   :  { %315 = vsyncadd [#allocation3], 4294967168 }
 0x305   :  { %224 = vsyncpa [#allocation3], 1 }

</bundles_post_ra>
